<compile_context>
chip_gen: v7x
topology: tpu7x:2x2x1
jax: 0.10.0
libtpu: 0.0.40
codegen_flags: <defaults>
</compile_context>

<pallas_src>
from math import sqrt

import jax
import jax.numpy as jnp
from jax.experimental import pallas as pl
from jax.experimental.pallas import tpu as pltpu


def conv_output_shape(h_w, kernel_size=1, stride=1, pad=0, dilation=1):
    """Same formula as the utils.conv_output_shape used by the module."""
    h = (h_w[0] + 2 * pad - dilation * (kernel_size - 1) - 1) // stride + 1
    w = (h_w[1] + 2 * pad - dilation * (kernel_size - 1) - 1) // stride + 1
    return h, w


def _round_up(a, b):
    return (a + b - 1) // b * b


def _lcn_kernel(x_ref, w_ref, b_ref, o_ref):
    # x_ref: (1, K, TP)  bf16 patches: kernel-window on sublanes, locations on lanes
    # w_ref: (K, F, TP)  bf16 weights for every filter at these locations
    # b_ref: (F, TP)     f32 bias
    # o_ref: (1, F, TP)  f32 output
    x = x_ref[0].astype(jnp.float32)            # single upcast per tile (v5e-friendly)
    acc = b_ref[...]                            # f32 accumulator, starts at the bias
    nk = w_ref.shape[0]                         # K = kh*kw (small, static)
    for k in range(nk):                         # static unroll: dense VPU MACs, no XLU reduce
        wk = w_ref[k].astype(jnp.float32)       # (F, TP) lane-dense slab
        acc = acc + wk * x[k:k + 1, :]          # broadcast one patch row over the F filters
    o_ref[0] = acc


def conv2d_local_forward(x, weight, bias, *, in_channels, nfilters, kernel_size,
                         stride, padding, height_span, width_span,
                         param_dtype=jnp.bfloat16, p_tile=1024):
    """Reproduces Conv2d_Local.forward exactly (same row-major reshape/repeat
    semantics as the PyTorch module)."""
    N, C, H, W = x.shape
    assert C == in_channels, "module's broadcast requires C == in_channels"
    kh = kw = kernel_size
    dh = dw = stride
    F = nfilters

    # F.pad(x, (pad, pad, pad, pad))
    xp = jnp.pad(x, ((0, 0), (0, 0), (padding, padding), (padding, padding)))
    Hp, Wp = xp.shape[2], xp.shape[3]
    H_out = (Hp - kh) // dh + 1
    W_out = (Wp - kw) // dw + 1
    assert (H_out, W_out) == (height_span, width_span)

    K = kh * kw
    P = C * H_out * W_out          # per-filter (location, channel) axis -> lanes
    Q = H_out * W_out
    assert weight.shape == (F * Q, in_channels, kh, kw)

    # Unfolded patches with the kernel-window axis leading and P on the last
    # (lane) axis:  x2[n, (i,j), (c,h,w)] = xp[n, c, h*dh + i, w*dw + j]
    r = jnp.arange(kh)[:, None] + (jnp.arange(H_out) * dh)[None, :]      # (kh, H_out)
    ccol = jnp.arange(kw)[:, None] + (jnp.arange(W_out) * dw)[None, :]   # (kw, W_out)
    g = xp[:, :, r, :]                       # (N, C, kh, H_out, Wp)
    g = g[:, :, :, :, ccol]                  # (N, C, kh, H_out, kw, W_out)
    g = g.transpose(0, 2, 4, 1, 3, 5)        # (N, kh, kw, C, H_out, W_out)
    x2 = g.reshape(N, K, P).astype(jnp.float32)

    # Weights to (K, F, P) so every k-slab is a lane-dense (F, TP) block;
    # bias to (F, P).  (Same element correspondence as the torch reshape/repeat.)
    w3 = weight.reshape(F, Q, in_channels, kh, kw).transpose(3, 4, 0, 1, 2)
    w3 = w3.reshape(K, F, P).astype(jnp.float32)
    b3 = bias.reshape(F, P).astype(jnp.float32)

    # Pad P to a multiple of the lane tile so stores are unmasked & lane-dense.
    TP = _round_up(min(p_tile, _round_up(P, 128)), 128)
    P_pad = _round_up(P, TP)
    dp = P_pad - P
    if dp:
        x2 = jnp.pad(x2, ((0, 0), (0, 0), (0, dp)))
        w3 = jnp.pad(w3, ((0, 0), (0, 0), (0, dp)))
        b3 = jnp.pad(b3, ((0, 0), (0, dp)))
    num_p_tiles = P_pad // TP

    # bf16 over HBM (memory-bound op), f32 accumulation inside the kernel.
    x2 = x2.astype(param_dtype)
    w3 = w3.astype(param_dtype)

    out = pl.pallas_call(
        _lcn_kernel,
        out_shape=jax.ShapeDtypeStruct((N, F, P_pad), jnp.float32),
        grid_spec=pltpu.PrefetchScalarGridSpec(
            num_scalar_prefetch=0,
            # batch innermost: weight/bias block index repeats across consecutive
            # steps -> weights are DMA'd once per P-tile, not once per (tile, batch).
            grid=(num_p_tiles, N),
            in_specs=[
                pl.BlockSpec((1, K, TP), lambda j, n: (n, 0, j)),   # patches (filter-independent)
                pl.BlockSpec((K, F, TP), lambda j, n: (0, 0, j)),   # all-filter weights of this tile
                pl.BlockSpec((F, TP), lambda j, n: (0, j)),         # bias
            ],
            out_specs=pl.BlockSpec((1, F, TP), lambda j, n: (n, 0, j)),
        ),
        compiler_params=pltpu.CompilerParams(
            dimension_semantics=("parallel", "parallel")),
    )(x2, w3, b3)

    out = out[:, :, :P]
    # Mirrors the module's final x.view(-1, nfilters, height_span, width_span)
    # (round-trips cleanly for in_channels == 1, exactly like the original).
    return out.reshape(-1, nfilters, height_span, width_span)


def _reference_forward(x, weight, bias, *, in_channels, nfilters, kernel_size,
                       stride, padding, height_span, width_span):
    """Pure-JAX replica of the PyTorch forward, for correctness checking."""
    N = x.shape[0]
    kh = kw = kernel_size
    dh = dw = stride
    xp = jnp.pad(x, ((0, 0), (0, 0), (padding, padding), (padding, padding)))
    Hp, Wp = xp.shape[2], xp.shape[3]
    H_out = (Hp - kh) // dh + 1
    W_out = (Wp - kw) // dw + 1
    rows = (jnp.arange(H_out) * dh)[:, None] + jnp.arange(kh)[None, :]
    cols = (jnp.arange(W_out) * dw)[:, None] + jnp.arange(kw)[None, :]
    p = xp[:, :, rows, :][:, :, :, :, cols].transpose(0, 1, 2, 4, 3, 5)
    p = p.reshape(N, -1, in_channels, kh, kw)
    p = jnp.tile(p, (1, nfilters, 1, 1, 1))
    o = jnp.sum(p * weight[None], axis=(-1, -2)) + bias[None]
    return o.reshape(-1, nfilters, height_span, width_span)


if __name__ == "__main__":
    # Small shapes consistent with the module.
    batch = 2
    in_channels = 1
    nfilters = 4
    h = w = 16
    kernel_size = 4
    stride = 4
    padding = 0

    height_span, width_span = conv_output_shape((h, w), kernel_size, stride)
    n_locs = height_span * width_span * nfilters

    # Deterministic parameter init (matches the torch init distributions).
    key = jax.random.PRNGKey(0)
    kx, kw_, kb = jax.random.split(key, 3)
    fan_in = in_channels * kernel_size * kernel_size
    w_bound = 1.0 / sqrt(fan_in)   # kaiming_uniform with a=sqrt(5) -> 1/sqrt(fan_in)
    b_bound = 1.0 / sqrt(fan_in)
    weight = jax.random.uniform(
        kw_, (n_locs, in_channels, kernel_size, kernel_size),
        minval=-w_bound, maxval=w_bound, dtype=jnp.float32)
    bias = jax.random.uniform(
        kb, (n_locs, in_channels), minval=-b_bound, maxval=b_bound,
        dtype=jnp.float32)

    x = jax.random.normal(kx, (batch, in_channels, h, w), dtype=jnp.float32)

    out = conv2d_local_forward(
        x, weight, bias,
        in_channels=in_channels, nfilters=nfilters, kernel_size=kernel_size,
        stride=stride, padding=padding,
        height_span=height_span, width_span=width_span)
    out = jax.block_until_ready(out)

    # Reference on the same bf16-rounded inputs (kernel casts x/w to bf16 for
    # HBM and accumulates in f32), so the comparison is numerically tight.
    x_r = x.astype(jnp.bfloat16).astype(jnp.float32)
    w_r = weight.astype(jnp.bfloat16).astype(jnp.float32)
    ref = _reference_forward(
        x_r, w_r, bias,
        in_channels=in_channels, nfilters=nfilters, kernel_size=kernel_size,
        stride=stride, padding=padding,
        height_span=height_span, width_span=width_span)
    ref = jax.block_until_ready(ref)

    assert out.shape == (batch * in_channels, nfilters, height_span, width_span), out.shape
    assert jnp.allclose(out, ref, atol=2e-5, rtol=1e-5), float(jnp.max(jnp.abs(out - ref)))
    print("KERNEL_OK")
</pallas_src>

<mosaic_0001>
module attributes {stable_mosaic.version = 11 : i64} {
  func.func @_lcn_kernel(%arg0: i32, %arg1: i32, %arg2: memref<1x16x128xbf16, #tpu.memory_space<vmem>>, %arg3: memref<16x4x128xbf16, #tpu.memory_space<vmem>>, %arg4: memref<4x128xf32, #tpu.memory_space<vmem>>, %arg5: memref<1x4x128xf32, #tpu.memory_space<vmem>>) attributes {dimension_semantics = [#tpu.dimension_semantics<parallel>, #tpu.dimension_semantics<parallel>], iteration_bounds = array<i64: 1, 2>, scalar_prefetch = 0 : i64, scratch_operands = 0 : i64, tpu.core_type = #tpu.core_type<tc>, window_params = [{transform_indices = @transform_0, window_bounds = array<i64: 1, 16, 128>}, {transform_indices = @transform_1, window_bounds = array<i64: 16, 4, 128>}, {transform_indices = @transform_2, window_bounds = array<i64: 4, 128>}, {transform_indices = @transform_3, window_bounds = array<i64: 1, 4, 128>}]} {
    %c0 = arith.constant 0 : index
    %c0_0 = arith.constant 0 : index
    %c0_1 = arith.constant 0 : index
    %0 = vector.load %arg2[%c0, %c0_0, %c0_1] : memref<1x16x128xbf16, #tpu.memory_space<vmem>>, vector<1x16x128xbf16>
    %1 = vector.shape_cast %0 : vector<1x16x128xbf16> to vector<16x128xbf16>
    %2 = arith.extf %1 : vector<16x128xbf16> to vector<16x128xf32>
    %c0_2 = arith.constant 0 : index
    %c0_3 = arith.constant 0 : index
    %3 = vector.load %arg4[%c0_2, %c0_3] : memref<4x128xf32, #tpu.memory_space<vmem>>, vector<4x128xf32>
    %c0_4 = arith.constant 0 : index
    %c0_5 = arith.constant 0 : index
    %c0_6 = arith.constant 0 : index
    %4 = vector.load %arg3[%c0_4, %c0_5, %c0_6] : memref<16x4x128xbf16, #tpu.memory_space<vmem>>, vector<1x4x128xbf16>
    %5 = vector.shape_cast %4 : vector<1x4x128xbf16> to vector<4x128xbf16>
    %6 = arith.extf %5 : vector<4x128xbf16> to vector<4x128xf32>
    %7 = vector.extract_strided_slice %2 {offsets = [0, 0], sizes = [1, 128], strides = [1, 1]} : vector<16x128xf32> to vector<1x128xf32>
    %8 = vector.broadcast %7 : vector<1x128xf32> to vector<4x128xf32>
    %9 = arith.mulf %6, %8 : vector<4x128xf32>
    %10 = arith.addf %3, %9 : vector<4x128xf32>
    %c1 = arith.constant 1 : index
    %c0_7 = arith.constant 0 : index
    %c0_8 = arith.constant 0 : index
    %11 = vector.load %arg3[%c1, %c0_7, %c0_8] : memref<16x4x128xbf16, #tpu.memory_space<vmem>>, vector<1x4x128xbf16>
    %12 = vector.shape_cast %11 : vector<1x4x128xbf16> to vector<4x128xbf16>
    %13 = arith.extf %12 : vector<4x128xbf16> to vector<4x128xf32>
    %14 = vector.extract_strided_slice %2 {offsets = [1, 0], sizes = [1, 128], strides = [1, 1]} : vector<16x128xf32> to vector<1x128xf32>
    %15 = vector.broadcast %14 : vector<1x128xf32> to vector<4x128xf32>
    %16 = arith.mulf %13, %15 : vector<4x128xf32>
    %17 = arith.addf %10, %16 : vector<4x128xf32>
    %c2 = arith.constant 2 : index
    %c0_9 = arith.constant 0 : index
    %c0_10 = arith.constant 0 : index
    %18 = vector.load %arg3[%c2, %c0_9, %c0_10] : memref<16x4x128xbf16, #tpu.memory_space<vmem>>, vector<1x4x128xbf16>
    %19 = vector.shape_cast %18 : vector<1x4x128xbf16> to vector<4x128xbf16>
    %20 = arith.extf %19 : vector<4x128xbf16> to vector<4x128xf32>
    %21 = vector.extract_strided_slice %2 {offsets = [2, 0], sizes = [1, 128], strides = [1, 1]} : vector<16x128xf32> to vector<1x128xf32>
    %22 = vector.broadcast %21 : vector<1x128xf32> to vector<4x128xf32>
    %23 = arith.mulf %20, %22 : vector<4x128xf32>
    %24 = arith.addf %17, %23 : vector<4x128xf32>
    %c3 = arith.constant 3 : index
    %c0_11 = arith.constant 0 : index
    %c0_12 = arith.constant 0 : index
    %25 = vector.load %arg3[%c3, %c0_11, %c0_12] : memref<16x4x128xbf16, #tpu.memory_space<vmem>>, vector<1x4x128xbf16>
    %26 = vector.shape_cast %25 : vector<1x4x128xbf16> to vector<4x128xbf16>
    %27 = arith.extf %26 : vector<4x128xbf16> to vector<4x128xf32>
    %28 = vector.extract_strided_slice %2 {offsets = [3, 0], sizes = [1, 128], strides = [1, 1]} : vector<16x128xf32> to vector<1x128xf32>
    %29 = vector.broadcast %28 : vector<1x128xf32> to vector<4x128xf32>
    %30 = arith.mulf %27, %29 : vector<4x128xf32>
    %31 = arith.addf %24, %30 : vector<4x128xf32>
    %c4 = arith.constant 4 : index
    %c0_13 = arith.constant 0 : index
    %c0_14 = arith.constant 0 : index
    %32 = vector.load %arg3[%c4, %c0_13, %c0_14] : memref<16x4x128xbf16, #tpu.memory_space<vmem>>, vector<1x4x128xbf16>
    %33 = vector.shape_cast %32 : vector<1x4x128xbf16> to vector<4x128xbf16>
    %34 = arith.extf %33 : vector<4x128xbf16> to vector<4x128xf32>
    %35 = vector.extract_strided_slice %2 {offsets = [4, 0], sizes = [1, 128], strides = [1, 1]} : vector<16x128xf32> to vector<1x128xf32>
    %36 = vector.broadcast %35 : vector<1x128xf32> to vector<4x128xf32>
    %37 = arith.mulf %34, %36 : vector<4x128xf32>
    %38 = arith.addf %31, %37 : vector<4x128xf32>
    %c5 = arith.constant 5 : index
    %c0_15 = arith.constant 0 : index
    %c0_16 = arith.constant 0 : index
    %39 = vector.load %arg3[%c5, %c0_15, %c0_16] : memref<16x4x128xbf16, #tpu.memory_space<vmem>>, vector<1x4x128xbf16>
    %40 = vector.shape_cast %39 : vector<1x4x128xbf16> to vector<4x128xbf16>
    %41 = arith.extf %40 : vector<4x128xbf16> to vector<4x128xf32>
    %42 = vector.extract_strided_slice %2 {offsets = [5, 0], sizes = [1, 128], strides = [1, 1]} : vector<16x128xf32> to vector<1x128xf32>
    %43 = vector.broadcast %42 : vector<1x128xf32> to vector<4x128xf32>
    %44 = arith.mulf %41, %43 : vector<4x128xf32>
    %45 = arith.addf %38, %44 : vector<4x128xf32>
    %c6 = arith.constant 6 : index
    %c0_17 = arith.constant 0 : index
    %c0_18 = arith.constant 0 : index
    %46 = vector.load %arg3[%c6, %c0_17, %c0_18] : memref<16x4x128xbf16, #tpu.memory_space<vmem>>, vector<1x4x128xbf16>
    %47 = vector.shape_cast %46 : vector<1x4x128xbf16> to vector<4x128xbf16>
    %48 = arith.extf %47 : vector<4x128xbf16> to vector<4x128xf32>
    %49 = vector.extract_strided_slice %2 {offsets = [6, 0], sizes = [1, 128], strides = [1, 1]} : vector<16x128xf32> to vector<1x128xf32>
    %50 = vector.broadcast %49 : vector<1x128xf32> to vector<4x128xf32>
    %51 = arith.mulf %48, %50 : vector<4x128xf32>
    %52 = arith.addf %45, %51 : vector<4x128xf32>
    %c7 = arith.constant 7 : index
    %c0_19 = arith.constant 0 : index
    %c0_20 = arith.constant 0 : index
    %53 = vector.load %arg3[%c7, %c0_19, %c0_20] : memref<16x4x128xbf16, #tpu.memory_space<vmem>>, vector<1x4x128xbf16>
    %54 = vector.shape_cast %53 : vector<1x4x128xbf16> to vector<4x128xbf16>
    %55 = arith.extf %54 : vector<4x128xbf16> to vector<4x128xf32>
    %56 = vector.extract_strided_slice %2 {offsets = [7, 0], sizes = [1, 128], strides = [1, 1]} : vector<16x128xf32> to vector<1x128xf32>
    %57 = vector.broadcast %56 : vector<1x128xf32> to vector<4x128xf32>
    %58 = arith.mulf %55, %57 : vector<4x128xf32>
    %59 = arith.addf %52, %58 : vector<4x128xf32>
    %c8 = arith.constant 8 : index
    %c0_21 = arith.constant 0 : index
    %c0_22 = arith.constant 0 : index
    %60 = vector.load %arg3[%c8, %c0_21, %c0_22] : memref<16x4x128xbf16, #tpu.memory_space<vmem>>, vector<1x4x128xbf16>
    %61 = vector.shape_cast %60 : vector<1x4x128xbf16> to vector<4x128xbf16>
    %62 = arith.extf %61 : vector<4x128xbf16> to vector<4x128xf32>
    %63 = vector.extract_strided_slice %2 {offsets = [8, 0], sizes = [1, 128], strides = [1, 1]} : vector<16x128xf32> to vector<1x128xf32>
    %64 = vector.broadcast %63 : vector<1x128xf32> to vector<4x128xf32>
    %65 = arith.mulf %62, %64 : vector<4x128xf32>
    %66 = arith.addf %59, %65 : vector<4x128xf32>
    %c9 = arith.constant 9 : index
    %c0_23 = arith.constant 0 : index
    %c0_24 = arith.constant 0 : index
    %67 = vector.load %arg3[%c9, %c0_23, %c0_24] : memref<16x4x128xbf16, #tpu.memory_space<vmem>>, vector<1x4x128xbf16>
    %68 = vector.shape_cast %67 : vector<1x4x128xbf16> to vector<4x128xbf16>
    %69 = arith.extf %68 : vector<4x128xbf16> to vector<4x128xf32>
    %70 = vector.extract_strided_slice %2 {offsets = [9, 0], sizes = [1, 128], strides = [1, 1]} : vector<16x128xf32> to vector<1x128xf32>
    %71 = vector.broadcast %70 : vector<1x128xf32> to vector<4x128xf32>
    %72 = arith.mulf %69, %71 : vector<4x128xf32>
    %73 = arith.addf %66, %72 : vector<4x128xf32>
    %c10 = arith.constant 10 : index
    %c0_25 = arith.constant 0 : index
    %c0_26 = arith.constant 0 : index
    %74 = vector.load %arg3[%c10, %c0_25, %c0_26] : memref<16x4x128xbf16, #tpu.memory_space<vmem>>, vector<1x4x128xbf16>
    %75 = vector.shape_cast %74 : vector<1x4x128xbf16> to vector<4x128xbf16>
    %76 = arith.extf %75 : vector<4x128xbf16> to vector<4x128xf32>
    %77 = vector.extract_strided_slice %2 {offsets = [10, 0], sizes = [1, 128], strides = [1, 1]} : vector<16x128xf32> to vector<1x128xf32>
    %78 = vector.broadcast %77 : vector<1x128xf32> to vector<4x128xf32>
    %79 = arith.mulf %76, %78 : vector<4x128xf32>
    %80 = arith.addf %73, %79 : vector<4x128xf32>
    %c11 = arith.constant 11 : index
    %c0_27 = arith.constant 0 : index
    %c0_28 = arith.constant 0 : index
    %81 = vector.load %arg3[%c11, %c0_27, %c0_28] : memref<16x4x128xbf16, #tpu.memory_space<vmem>>, vector<1x4x128xbf16>
    %82 = vector.shape_cast %81 : vector<1x4x128xbf16> to vector<4x128xbf16>
    %83 = arith.extf %82 : vector<4x128xbf16> to vector<4x128xf32>
    %84 = vector.extract_strided_slice %2 {offsets = [11, 0], sizes = [1, 128], strides = [1, 1]} : vector<16x128xf32> to vector<1x128xf32>
    %85 = vector.broadcast %84 : vector<1x128xf32> to vector<4x128xf32>
    %86 = arith.mulf %83, %85 : vector<4x128xf32>
    %87 = arith.addf %80, %86 : vector<4x128xf32>
    %c12 = arith.constant 12 : index
    %c0_29 = arith.constant 0 : index
    %c0_30 = arith.constant 0 : index
    %88 = vector.load %arg3[%c12, %c0_29, %c0_30] : memref<16x4x128xbf16, #tpu.memory_space<vmem>>, vector<1x4x128xbf16>
    %89 = vector.shape_cast %88 : vector<1x4x128xbf16> to vector<4x128xbf16>
    %90 = arith.extf %89 : vector<4x128xbf16> to vector<4x128xf32>
    %91 = vector.extract_strided_slice %2 {offsets = [12, 0], sizes = [1, 128], strides = [1, 1]} : vector<16x128xf32> to vector<1x128xf32>
    %92 = vector.broadcast %91 : vector<1x128xf32> to vector<4x128xf32>
    %93 = arith.mulf %90, %92 : vector<4x128xf32>
    %94 = arith.addf %87, %93 : vector<4x128xf32>
    %c13 = arith.constant 13 : index
    %c0_31 = arith.constant 0 : index
    %c0_32 = arith.constant 0 : index
    %95 = vector.load %arg3[%c13, %c0_31, %c0_32] : memref<16x4x128xbf16, #tpu.memory_space<vmem>>, vector<1x4x128xbf16>
    %96 = vector.shape_cast %95 : vector<1x4x128xbf16> to vector<4x128xbf16>
    %97 = arith.extf %96 : vector<4x128xbf16> to vector<4x128xf32>
    %98 = vector.extract_strided_slice %2 {offsets = [13, 0], sizes = [1, 128], strides = [1, 1]} : vector<16x128xf32> to vector<1x128xf32>
    %99 = vector.broadcast %98 : vector<1x128xf32> to vector<4x128xf32>
    %100 = arith.mulf %97, %99 : vector<4x128xf32>
    %101 = arith.addf %94, %100 : vector<4x128xf32>
    %c14 = arith.constant 14 : index
    %c0_33 = arith.constant 0 : index
    %c0_34 = arith.constant 0 : index
    %102 = vector.load %arg3[%c14, %c0_33, %c0_34] : memref<16x4x128xbf16, #tpu.memory_space<vmem>>, vector<1x4x128xbf16>
    %103 = vector.shape_cast %102 : vector<1x4x128xbf16> to vector<4x128xbf16>
    %104 = arith.extf %103 : vector<4x128xbf16> to vector<4x128xf32>
    %105 = vector.extract_strided_slice %2 {offsets = [14, 0], sizes = [1, 128], strides = [1, 1]} : vector<16x128xf32> to vector<1x128xf32>
    %106 = vector.broadcast %105 : vector<1x128xf32> to vector<4x128xf32>
    %107 = arith.mulf %104, %106 : vector<4x128xf32>
    %108 = arith.addf %101, %107 : vector<4x128xf32>
    %c15 = arith.constant 15 : index
    %c0_35 = arith.constant 0 : index
    %c0_36 = arith.constant 0 : index
    %109 = vector.load %arg3[%c15, %c0_35, %c0_36] : memref<16x4x128xbf16, #tpu.memory_space<vmem>>, vector<1x4x128xbf16>
    %110 = vector.shape_cast %109 : vector<1x4x128xbf16> to vector<4x128xbf16>
    %111 = arith.extf %110 : vector<4x128xbf16> to vector<4x128xf32>
    %112 = vector.extract_strided_slice %2 {offsets = [15, 0], sizes = [1, 128], strides = [1, 1]} : vector<16x128xf32> to vector<1x128xf32>
    %113 = vector.broadcast %112 : vector<1x128xf32> to vector<4x128xf32>
    %114 = arith.mulf %111, %113 : vector<4x128xf32>
    %115 = arith.addf %108, %114 : vector<4x128xf32>
    %c0_37 = arith.constant 0 : index
    %c0_38 = arith.constant 0 : index
    %c0_39 = arith.constant 0 : index
    %116 = vector.load %arg5[%c0_37, %c0_38, %c0_39] : memref<1x4x128xf32, #tpu.memory_space<vmem>>, vector<1x4x128xf32>
    %117 = vector.shape_cast %116 : vector<1x4x128xf32> to vector<4x128xf32>
    %118 = vector.shape_cast %115 : vector<4x128xf32> to vector<1x4x128xf32>
    tpu.vector_store %arg5[%c0_37, %c0_38, %c0_39], %118 {strides = array<i32>} : memref<1x4x128xf32, #tpu.memory_space<vmem>>, vector<1x4x128xf32>,
    return
  }
  func.func @transform_0(%arg0: i32, %arg1: i32) -> (i32, i32, i32) {
    %c0_i32 = arith.constant 0 : i32
    %c0_i32_0 = arith.constant 0 : i32
    return %arg1, %c0_i32, %arg0 : i32, i32, i32
  }
  func.func @transform_1(%arg0: i32, %arg1: i32) -> (i32, i32, i32) {
    %c0_i32 = arith.constant 0 : i32
    %c0_i32_0 = arith.constant 0 : i32
    %c0_i32_1 = arith.constant 0 : i32
    return %c0_i32, %c0_i32_0, %arg0 : i32, i32, i32
  }
  func.func @transform_2(%arg0: i32, %arg1: i32) -> (i32, i32) {
    %c0_i32 = arith.constant 0 : i32
    %c0_i32_0 = arith.constant 0 : i32
    return %c0_i32, %arg0 : i32, i32
  }
  func.func @transform_3(%arg0: i32, %arg1: i32) -> (i32, i32, i32) {
    %c0_i32 = arith.constant 0 : i32
    %c0_i32_0 = arith.constant 0 : i32
    return %arg1, %c0_i32, %arg0 : i32, i32, i32
  }
}

</mosaic_0001>

<bundles_post_ra>
// kernel: tpu_custom_call.1
= control target key start
LH: loop header
LB: loop body
LE: loop exit
PB: predicated region body
PF: predicated region fallthrough
CT: control target
= control target key end

     0   :  { %8 = vsyncpa [#allocation3], 0  ;;  %s1020_s0 = inlined_call_operand.hbm [shape: bf16[2,16,128], index: 0, kind: input, shape index: {}]   ;;  %s1021_s1 = inlined_call_operand.hbm [shape: bf16[16,4,128], index: 1, kind: input, shape index: {}]   ;;  %s1022_s2 = inlined_call_operand.vmem [shape: f32[4,128], index: 2, kind: input, shape index: {}]   ;;  %s1023_s3 = inlined_call_operand.hbm [shape: f32[2,4,128], index: 3, kind: output, shape index: {}]  }
   0x1   :  { %10 = vsyncpa [#allocation3 + $0x1], 0 }
   0x2   :  { %11 = vsyncpa [#allocation6], 0 }
   0x3   :  { %12 = vsyncpa [#allocation4], 0 }
   0x4   :  { %14 = vsyncpa [#allocation4 + $0x1], 0  ;;  %s789_s12 = smov 0   ;;  %s791_s13 = smov 0  }
   0x5   :  { %s793_s14 = smov 0   ;;  %s795_s15 = smov 0  }
   0x6   :  { %s797_s16 = smov 0   ;;  %s799_s17 = smov 0  }
   0x7 LB: > { %s517_s18 = sadd.s32 4294967295, %s760_s17   ;;  %s518_s19 = sadd.s32 4294967294, %s760_s17   ;;  %s760_s17 = sphi %s799_s17, %s20_s17   ;;  %s756_s16 = sphi %s797_s16, %s1047_s16   ;;  %s752_s15 = sphi %s795_s15, %s1046_s15   ;;  %s748_s14 = sphi %s793_s14, %s1045_s14   ;;  %s744_s13 = sphi %s791_s13, %s1044_s13   ;;  %s740_s12 = sphi %s789_s12, %s1043_s12  }
   0x8   : > { %p54_p0 = scmp.ne.s32.totalorder %s744_s13, %s740_s12  ;;  %p823_p1 = scmp.eq.s32.totalorder %s517_s18, 0 }
   0x9   : > { %p827_p2 = scmp.eq.s32.totalorder %s517_s18, 1  ;;  %p138_p3 = scmp.eq.s32.totalorder %s518_s19, 1 }
   0xa   : > { %s1028_s20 = scalar_select %p823_p1, 1, 0 }
   0xb   : > { %s1029_s21 = scalar_select %p827_p2, 1, 0 }
   0xc   : > { %p833_p4 = por %p823_p1, %p54_p0  ;;  %p519_p5 = scmp.ge.s32.totalorder %s760_s17, 1 }
   0xd   : > { %p838_p6 = por %p138_p3, %p54_p0  ;;  %p145_p7 = scmp.lt.s32.totalorder %s760_s17, 3 }
   0xe   : > { %s1030_s22 = scalar_select %p833_p4, 1, 0 }
   0xf   : > { %s1031_s23 = scalar_select %p838_p6, 1, 0 }
  0x10   : > { %p843_p8 = pnand %p519_p5, %p145_p7  ;;  %s762_s25 = smov [#allocation5]  }
  0x11   : > { %s159_s26 = sshll.u32 %s762_s25, 4  ;;  %s29_s28 = sadd.s32 1, %s756_s16  ;;  %s160_s26 = int_to_ptr.vmem [resolvable:$true] %s159_s26 }
  0x12   : > { %s1032_s24 = scalar_select %p843_p8, 1, 0 }
  0x13   : > { %p547_p9 = pneg %p843_p8  ;;  %s616_s4 = scalar_lea.hbm %s1021_s1, 512 }
  0x14   : > { %p617_p12 = scmp.ne.s32.totalorder %s1021_s1, %s616_s4  ;;  %p623_p5 = scmp.lt.u32.totalorder %s616_s4, %s1021_s1 }
  0x15   : > { %p852_p11 = pnand %p547_p9, %p823_p1 }
  0x17   : > { %p618_p13 = pneg %p852_p11 }
  0x19   : > { %p619_p0 = pnand %p618_p13, %p617_p12 }
  0x1b   : > { %p620_p3 = pneg %p619_p0 }
  0x1d   : > { %p625_p7 = pnand %p623_p5, %p620_p3 }
  0x1f   : > { %628 = shalt.err (!%p625_p7)
}
  0x20   : > { %s629_s9 = scalar_lea.vmem %s160_s26, 512  ;;  %p637_p1 = scmp.lt.s32.totalorder %s160_s26, %s160_s26 }
  0x21   : > { %p630_p9 = scmp.ne.s32.totalorder %s160_s26, %s629_s9  ;;  %p638_p4 = scmp.lt.s32.totalorder %s629_s9, %s629_s9 }
  0x23   : > { %p632_p10 = pnand %p630_p9, %p618_p13  ;;  %p639_p8 = por %p638_p4, %p637_p1 }
  0x25   : > { %p633_p6 = pneg %p632_p10 }
  0x27   : > { %p640_p2 = pnand %p639_p8, %p633_p6 }
  0x29   : > { %643 = shalt.err (!%p640_p2)
}
  0x2a   : > { %s763_s10 = smov 32   ;;  %s764_s11 = smov 2  }
  0x2b   : > { %550 = dma.hbm_to_vmem [thread:$0]  (!%p852_p11), %s1021_s1, 512, %s160_s26, [#allocation6], %s763_s10, %s763_s10, %s764_s11  }
  0x2c   : > { %p30_p1 = scmp.ge.s32.totalorder %s29_s28, 2  ;;  %s41_s25 = sadd.s32 1, %s748_s14 }
  0x2d   : > { %p48_p2 = scmp.ne.s32.totalorder %s748_s14, %s744_s13  ;;  %p49_p4 = scmp.eq.s32.totalorder %s760_s17, 0 }
  0x2e   : > { %s1049_s28 = smov (%p30_p1, %s29_s28), 0  ;;  %p1035_p8 = scmp.ne.s32.totalorder %s1029_s21, 0 }
  0x2f   : > { %p879_p6 = por %p49_p4, %p48_p2  ;;  %s36_s27 = ssub.s32 %s756_s16, %s1049_s28 }
  0x30   : > { %p885_p10 = por %p1035_p8, %p48_p2  ;;  %p560_p12 = scmp.lt.s32.totalorder %s760_s17, 2 }
  0x31   : > { %p39_p11 = scmp.eq.s32.totalorder %s36_s27, 0  ;;  %s180_s26 = sand.u32 1, %s748_s14  }
  0x32   : > { %s523_s4 = sshll.u32 %s180_s26, 3  ;;  %s534_s6 = sshll.u32 %s756_s16, 7 }
  0x33   : > { %s894_s5 = scalar_select %p39_p11, %s748_s14, %s41_s25  }
  0x34   : > { %s900_s9 = scalar_lea.hbm %s1020_s0, %s534_s6  ;;  %s184_s21 = scalar_lea.vmem [#allocation2], %s523_s4 }
  0x35   : > { %s192_s10 = sshll.u32 %s184_s21, 4  ;;  %p906_p13 = pnand %p560_p12, %p879_p6  ;;  %s902_s10 = int_to_ptr.vmem [resolvable:$true] %s192_s10 }
  0x36   : > { %s910_s18 = scalar_lea.sflag [#allocation3], %s180_s26  ;;  %s644_s19 = scalar_lea.hbm %s900_s9, 128 }
  0x37   : > { %p645_p0 = scmp.ne.s32.totalorder %s900_s9, %s644_s19  ;;  %p646_p3 = pneg %p906_p13 }
  0x38   : > { %s649_s29 = scalar_lea.hbm %s1020_s0, 256  ;;  %p650_p9 = scmp.lt.u32.totalorder %s900_s9, %s1020_s0 }
  0x39   : > { %p647_p5 = pnand %p646_p3, %p645_p0  ;;  %p651_p1 = scmp.lt.u32.totalorder %s649_s29, %s644_s19 }
  0x3a   : > { %p653_p4 = scmp.lt.u32.totalorder %s644_s19, %s900_s9 }
  0x3b   : > { %p648_p7 = pneg %p647_p5  ;;  %p652_p2 = por %p651_p1, %p650_p9 }
  0x3d   : > { %p654_p6 = por %p653_p4, %p652_p2 }
  0x3f   : > { %p655_p8 = pnand %p654_p6, %p648_p7 }
  0x41   : > { %658 = shalt.err (!%p655_p8)
}
  0x42   : > { %s659_s26 = scalar_lea.vmem %s902_s10, 128  ;;  %s765_s7 = smov [#allocation2]  }
  0x43   : > { %p660_p12 = scmp.ne.s32.totalorder %s902_s10, %s659_s26  ;;  %s664_s8 = sshll.u32 %s765_s7, 4  ;;  %s665_s8 = int_to_ptr.vmem [resolvable:$false] %s664_s8 }
  0x44   : > { %s666_s21 = scalar_lea.vmem %s665_s8, 256  ;;  %p667_p5 = scmp.lt.s32.totalorder %s902_s10, %s665_s8 }
  0x45   : > { %p662_p11 = pnand %p660_p12, %p646_p3  ;;  %p668_p9 = scmp.lt.s32.totalorder %s666_s21, %s659_s26 }
  0x47   : > { %p663_p0 = pneg %p662_p11  ;;  %p669_p1 = por %p668_p9, %p667_p5 }
  0x49   : > { %p670_p2 = pnand %p669_p1, %p663_p0 }
  0x4b   : > { %673 = shalt.err (!%p670_p2)
}
  0x4c   : > { %s766_s19 = smov 64   ;;  %s767_s25 = smov 4  }
  0x4d   : > { %554 = dma.hbm_to_vmem [thread:$0]  (!%p906_p13), %s900_s9, 128, %s902_s10, %s910_s18, %s766_s19, %s766_s19, %s767_s25  }
  0x4e   : > { %p1038_p3 = scmp.ne.s32.totalorder %s1032_s24, 0 }
  0x4f   : > { %s941_s27 = sand.u32 (!%p1038_p3), 1, %s744_s13   ;;  %p1039_p7 = scmp.ne.s32.totalorder (!%p1038_p3), %s1030_s22, 0 }
  0x50   : > { %204 = sbr.rel (%p1038_p3) target bundleno = 147 (0x93), region = 32  ;;  %s527_s29 = sshll.u32 (!%p1038_p3), %s941_s27, 3 }
  0x51   : > { %s207_s4 = scalar_lea.sflag (!%p1038_p3), [#allocation3], %s941_s27  ;;  %s210_s6 = scalar_lea.vmem (!%p1038_p3), [#allocation2], %s527_s29 }
  0x57   : > { %727 = dma.done.wait (%p1039_p7), %s207_s4, 128  }
  0x58   : > { %729 = vsyncadd (%p1039_p7), %s207_s4, 4294967168  ;;  %p1040_p4 = scmp.ne.s32.totalorder %s1028_s20, 0 }
  0x5a   : > { %731 = dma.done.wait (%p1040_p4), [#allocation6], 512  }
  0x5b   : > { %733 = vsyncadd (%p1040_p4), [#allocation6], 4294966784  ;;  %v252_v0 = vlaneseq  ;;  %v536_v5 = vld [vmem:[%s210_s6] sm:$0xff]   ;;  %v250_v6 = vld [vmem:[#allocation5] sm:$0x3]  ;;  %s529_s24 = sshll.u32 %s941_s27, 2 }
  0x5c   : > { %v537_v7 = vunpack.c.l.bf16 %v536_v5  ;;  %v251_v8 = vunpack.c.l.bf16 %v250_v6  ;;  %v259_v9 = vld [vmem:[#allocation5 + $0x2] sm:$0x3]  ;;  %v268_v10 = vld [vmem:[#allocation5 + $0x4] sm:$0x3]  ;;  %v277_v13 = vld [vmem:[#allocation5 + $0x6] sm:$0x3]  ;;  %v538_v38 = vunpack.c.h.bf16 %v536_v5 }
  0x5d   : > { %v953_v1 = vshrl.u32 %v252_v0, 7  ;;  %v260_v12 = vunpack.c.l.bf16 %v259_v9  ;;  %v269_v17 = vunpack.c.l.bf16 %v268_v10  ;;  %v249_v19 = vld [vmem:[%s1022_s2] sm:$0xf]  ;;  %v286_v20 = vld [vmem:[#allocation5 + $0x8] sm:$0x3]  ;;  %v278_v24 = vunpack.c.l.bf16 %v277_v13  ;;  %s240_s9 = scalar_lea.vmem [#allocation7], %s529_s24 }
  0x5e   : > { %v295_v26 = vld [vmem:[#allocation5 + $0xa] sm:$0x3]  ;;  %v287_v30 = vunpack.c.l.bf16 %v286_v20  ;;  %v304_v32 = vld [vmem:[#allocation5 + $0xc] sm:$0x3]  ;;  %v313_v39 = vld [vmem:[#allocation5 + $0xe] sm:$0x3] }
  0x5f   : > { %v254_v2 = vsub.s32 0, %v953_v1  ;;  %v263_v3 = vsub.s32 1, %v953_v1  ;;  %v272_v4 = vsub.s32 2, %v953_v1  ;;  %v281_v11 = vsub.s32 3, %v953_v1  ;;  %v322_v44 = vld [vmem:[#allocation5 + $0x10] sm:$0x3] }
  0x60   : > { %v290_v14 = vsub.s32 4, %v953_v1  ;;  %v299_v21 = vsub.s32 5, %v953_v1  ;;  %v308_v27 = vsub.s32 6, %v953_v1  ;;  %v317_v33 = vsub.s32 7, %v953_v1  ;;  %v331_v49 = vld [vmem:[#allocation5 + $0x12] sm:$0x3] }
  0x61   : > { %v255_v15 = vrot.slane %v537_v7, %v254_v2  ;;  %v264_v16 = vrot.slane %v537_v7, %v263_v3  ;;  %v273_v18 = vrot.slane %v537_v7, %v272_v4  ;;  %v282_v25 = vrot.slane %v537_v7, %v281_v11  ;;  %v340_v54 = vld [vmem:[#allocation5 + $0x14] sm:$0x3]  ;;  %v349_v59 = vld [vmem:[#allocation5 + $0x16] sm:$0x3]  ;;  %v358_v0 = vld [vmem:[#allocation5 + $0x18] sm:$0x3] }
  0x62   : > { %v291_v31 = vrot.slane %v537_v7, %v290_v14  ;;  %v296_v36 = vunpack.c.l.bf16 %v295_v26  ;;  %v300_v37 = vrot.slane %v537_v7, %v299_v21  ;;  %v305_v42 = vunpack.c.l.bf16 %v304_v32  ;;  %v376_v13 = vld [vmem:[#allocation5 + $0x1c] sm:$0x3]  ;;  %s409_s10 = sshll.u32 %s240_s9, 4  ;;  %s531_s11 = sshll.u32 %s752_s15, 6  ;;  %s968_s10 = int_to_ptr.vmem [resolvable:$true] %s409_s10 }
  0x63   : > { %v256_v22 = vmul.f32 %v255_v15, %v251_v8  ;;  %v265_v23 = vmul.f32 %v264_v16, %v260_v12  ;;  %v274_v29 = vmul.f32 %v273_v18, %v269_v17  ;;  %v283_v35 = vmul.f32 %v282_v25, %v278_v24  ;;  %v367_v8 = vld [vmem:[#allocation5 + $0x1a] sm:$0x3]  ;;  %v385_v18 = vld [vmem:[#allocation5 + $0x1e] sm:$0x3]  ;;  %s973_s7 = scalar_lea.hbm %s1023_s3, %s531_s11  ;;  %s395_s8 = scalar_lea.sflag [#allocation4], %s941_s27 }
  0x64   : > { %v292_v41 = vmul.f32 %v291_v31, %v287_v30  ;;  %v309_v43 = vrot.slane %v537_v7, %v308_v27  ;;  %v301_v46 = vmul.f32 %v300_v37, %v296_v36  ;;  %v314_v47 = vunpack.c.l.bf16 %v313_v39  ;;  %s674_s21 = scalar_lea.vmem %s968_s10, 64  ;;  %s768_s15 = smov [#allocation7]  }
  0x65   : > { %v257_v28 = vadd.f32 %v256_v22, %v249_v19  ;;  %v318_v48 = vrot.slane %v537_v7, %v317_v33  ;;  %v323_v52 = vunpack.c.l.bf16 %v322_v44  ;;  %v327_v53 = vrot.slane %v538_v38, %v254_v2  ;;  %p675_p13 = scmp.ne.s32.totalorder %s968_s10, %s674_s21  ;;  %s678_s19 = sshll.u32 %s768_s15, 4  ;;  %s679_s19 = int_to_ptr.vmem [resolvable:$false] %s678_s19 }
  0x66   : > { %v310_v51 = vmul.f32 %v309_v43, %v305_v42  ;;  %v332_v57 = vunpack.c.l.bf16 %v331_v49  ;;  %v336_v58 = vrot.slane %v538_v38, %v263_v3  ;;  %v341_v62 = vunpack.c.l.bf16 %v340_v54  ;;  %s680_s25 = scalar_lea.vmem %s679_s19, 128  ;;  %p681_p12 = scmp.lt.s32.totalorder %s968_s10, %s679_s19 }
  0x67   : > { %v266_v34 = vadd.f32 %v265_v23, %v257_v28  ;;  %v319_v56 = vmul.f32 %v318_v48, %v314_v47  ;;  %v328_v61 = vmul.f32 %v327_v53, %v323_v52  ;;  %v345_v63 = vrot.slane %v538_v38, %v272_v4  ;;  %p676_p6 = pnand %p675_p13, %p885_p10  ;;  %p682_p11 = scmp.lt.s32.totalorder %s680_s25, %s674_s21 }
  0x68   : > { %v337_v5 = vmul.f32 %v336_v58, %v332_v57  ;;  %v350_v6 = vunpack.c.l.bf16 %v349_v59  ;;  %v354_v7 = vrot.slane %v538_v38, %v281_v11  ;;  %v359_v2 = vunpack.c.l.bf16 %v358_v0 }
  0x69   : > { %v275_v40 = vadd.f32 %v274_v29, %v266_v34  ;;  %v346_v10 = vmul.f32 %v345_v63, %v341_v62  ;;  %v363_v12 = vrot.slane %v538_v38, %v290_v14  ;;  %v368_v3 = vunpack.c.l.bf16 %v367_v8  ;;  %p677_p8 = pneg %p676_p6  ;;  %p683_p0 = por %p682_p11, %p681_p12 }
  0x6a   : > { %v355_v16 = vmul.f32 %v354_v7, %v350_v6  ;;  %v372_v17 = vrot.slane %v538_v38, %v299_v21  ;;  %v377_v20 = vunpack.c.l.bf16 %v376_v13  ;;  %v381_v22 = vrot.slane %v538_v38, %v308_v27 }
  0x6b   : > { %v284_v45 = vadd.f32 %v283_v35, %v275_v40  ;;  %v364_v4 = vmul.f32 %v363_v12, %v359_v2  ;;  %v386_v24 = vunpack.c.l.bf16 %v385_v18  ;;  %v390_v25 = vrot.slane %v538_v38, %v317_v33  ;;  %p684_p5 = pnand %p683_p0, %p677_p8 }
  0x6c   : > { %v373_v11 = vmul.f32 %v372_v17, %v368_v3  ;;  %v382_v14 = vmul.f32 %v381_v22, %v377_v20 }
  0x6d   : > { %v293_v50 = vadd.f32 %v292_v41, %v284_v45  ;;  %v391_v29 = vmul.f32 %v390_v25, %v386_v24 }
  0x6f   : > { %v302_v55 = vadd.f32 %v301_v46, %v293_v50 }
  0x71   : > { %v311_v60 = vadd.f32 %v310_v51, %v302_v55 }
  0x73   : > { %v320_v1 = vadd.f32 %v319_v56, %v311_v60 }
  0x75   : > { %v329_v9 = vadd.f32 %v328_v61, %v320_v1 }
  0x77   : > { %v338_v15 = vadd.f32 %v337_v5, %v329_v9 }
  0x79   : > { %v347_v19 = vadd.f32 %v346_v10, %v338_v15 }
  0x7b   : > { %v356_v23 = vadd.f32 %v355_v16, %v347_v19 }
  0x7d   : > { %v365_v26 = vadd.f32 %v364_v4, %v356_v23 }
  0x7f   : > { %v374_v28 = vadd.f32 %v373_v11, %v365_v26 }
  0x81   : > { %v383_v21 = vadd.f32 %v382_v14, %v374_v28 }
  0x83   : > { %v392_v30 = vadd.f32 %v391_v29, %v383_v21 }
  0x85   : > { %393 = vst [vmem:[%s240_s9] sm:$0xf] %v392_v30 }
  0x86   : > { %687 = shalt.err (!%p684_p5)
}
  0x87   : > { %s688_s27 = scalar_lea.hbm %s973_s7, 64  ;;  %s692_s6 = scalar_lea.hbm %s1023_s3, 128 }
  0x88   : > { %p689_p9 = scmp.ne.s32.totalorder %s973_s7, %s688_s27  ;;  %p693_p3 = scmp.lt.u32.totalorder %s973_s7, %s1023_s3 }
  0x89   : > { %p694_p7 = scmp.lt.u32.totalorder %s692_s6, %s688_s27  ;;  %p696_p13 = scmp.lt.u32.totalorder %s688_s27, %s973_s7 }
  0x8a   : > { %p690_p1 = pnand %p689_p9, %p885_p10 }
  0x8b   : > { %p695_p4 = por %p694_p7, %p693_p3 }
  0x8c   : > { %p691_p2 = pneg %p690_p1 }
  0x8d   : > { %p697_p6 = por %p696_p13, %p695_p4 }
  0x8f   : > { %p698_p8 = pnand %p697_p6, %p691_p2 }
  0x91   : > { %701 = shalt.err (!%p698_p8)
}
  0x92   : > { %545 = dma.vmem_to_hbm [thread:$0]  (%p885_p10), %s968_s10, 64, %s973_s7, %s395_s8  }
  0x93 PF: > { %s421_s24 = sand.u32 1, %s740_s12   ;;  %p1041_p12 = scmp.ne.s32.totalorder %s1031_s23, 0 }
  0x94   : > { %p1042_p11 = scmp.ge.s32.totalorder %s760_s17, 2  ;;  %s422_s9 = scalar_lea.sflag [#allocation4], %s421_s24 }
  0x96   : > { %p556_p0 = pnand %p1042_p11, %p1041_p12 }
  0x98   : > { %735 = dma.done.wait (!%p556_p0), %s422_s9, 64  }
  0x99   : > { %737 = vsyncadd (!%p556_p0), %s422_s9, 4294967232  ;;  %s20_s17 = sadd.s32 1, %s760_s17   ;;  %s1043_s12 = smov %s744_s13 }
  0x9a   : > { %p17_p5 = scmp.ge.s32.totalorder %s20_s17, 4   ;;  %s1044_s13 = smov %s748_s14 }
  0x9b   : > { %s1045_s14 = smov %s894_s5  ;;  %s1046_s15 = smov %s756_s16 }
  0x9c   : > { %s1047_s16 = smov %s1049_s28  ;;  %19 = sbr.rel (!%p17_p5) target bundleno = 7 (0x7), region = 100 }
  0xa3   :  { %427 = vsyncpa [#allocation3], 1 }
  0xa4   :  { %429 = vsyncpa [#allocation3 + $0x1], 1 }
  0xa5   :  { %430 = vsyncpa [#allocation6], 1 }
  0xa6   :  { %431 = vsyncpa [#allocation4], 1 }
  0xa7   :  { %433 = vsyncpa [#allocation4 + $0x1], 1 }

</bundles_post_ra>
